<compile_context>
chip_gen: v7x
topology: tpu7x:2x2x1
jax: 0.10.0
libtpu: 0.0.40
codegen_flags: <defaults>
</compile_context>

<pallas_src>
import functools

import jax
import jax.numpy as jnp
from jax import lax
from jax.experimental import pallas as pl
from jax.experimental.pallas import tpu as pltpu


def _arcsin_unit_f32(x):
    """Float32 arcsin for x in [0, 1] (Cephes asinf: sqrt + minimax poly)."""
    big = x > 0.5
    z = jnp.where(big, 0.5 * (1.0 - x), x * x)
    s = jnp.where(big, jnp.sqrt(z), x)
    p = ((((4.2163199048e-2 * z + 2.4181311049e-2) * z + 4.5470025998e-2) * z
          + 7.4953002686e-2) * z + 1.6666752422e-1)
    r = p * z * s + s
    return jnp.where(big, jnp.float32(1.5707963267948966) - 2.0 * r, r)


def _prompt_kernel(x_ref, e_ref, part_ref, *, n_rows, tile_n, matmul_dtype):
    """One N-tile of sum_{i,j} arcsin(||x_i^ - e_j^|| / 2)^2.

    x_ref    : (TN, D)      f32 VMEM -- tile of cutout embeddings (remainder
                                        rows of the last tile are garbage and
                                        masked below)
    e_ref    : (M, D)       matmul_dtype VMEM -- prompt embeddings, already
                                        unit-normalized in the wrapper
    part_ref : (1, 8, 128)  f32 VMEM -- per-tile partial sum (scalar broadcast)
    """
    eps2 = jnp.float32(1e-24)   # F.normalize eps=1e-12, squared

    x = x_ref[...]                                                 # (TN, D) f32

    # Inverse row norms via rsqrt (EUP slot); fold into x BEFORE the matmul so
    # no broadcast multiply touches the (M, TN) pairwise tile.
    x_inv = lax.rsqrt(jnp.maximum(jnp.sum(x * x, axis=1, keepdims=True), eps2))
    x_hat = (x * x_inv).astype(matmul_dtype)                       # (TN, D)
    e_hat = e_ref[...]                                             # (M, D)

    # Pairwise cosines, lane-dense in the big N dimension: (M, TN).
    # (q @ k.T pattern; bf16 operands hit native MXU rate, f32 accumulate.)
    cos = lax.dot_general(e_hat, x_hat, (((1,), (1,)), ((), ())),
                          preferred_element_type=jnp.float32)      # (M, TN)

    # For unit vectors: ||a - b|| / 2 == sqrt(2 - 2 cos) / 2, in [0, 1].
    # Single-sided clamps guard fp overshoot of |cos| past 1.
    half_chord = jnp.minimum(0.5 * jnp.sqrt(jnp.maximum(2.0 - 2.0 * cos, 0.0)),
                             1.0)
    theta = _arcsin_unit_f32(half_chord)                           # (M, TN)
    t2 = theta * theta

    # Mask columns beyond the true N (last tile may be partial; those columns
    # came from unspecified VMEM contents and may be NaN -- where() discards
    # the unselected branch, so this is safe).
    col = (pl.program_id(0) * tile_n
           + lax.broadcasted_iota(jnp.int32, t2.shape, 1))
    t2 = jnp.where(col < n_rows, t2, 0.0)

    # Scalar factors (2, sign(w), |w|, 1/(N*M)) are applied once in the
    # wrapper; the kernel only produces sum(arcsin(.)^2) for its tile.
    part_ref[...] = jnp.broadcast_to(jnp.sum(t2), part_ref.shape)


def prompt_forward(x, embed, weight, *, max_tile_n=512,
                   matmul_dtype=jnp.bfloat16):
    """Pallas equivalent of Prompt(embed, weight).forward(x). Returns a scalar."""
    x = jnp.asarray(x, jnp.float32)
    embed = jnp.asarray(embed, jnp.float32)
    w = jnp.asarray(weight, jnp.float32)

    N, D = x.shape
    M, D2 = embed.shape
    assert D == D2, "input and embed feature dims must match"

    # Hoisted prompt normalization: one tiny wrapper pass over (M, D), stored
    # directly in the matmul dtype.  (Matches F.normalize's max(||e||, 1e-12).)
    e_norm = jnp.maximum(
        jnp.sqrt(jnp.sum(embed * embed, axis=1, keepdims=True)), 1e-12)
    e_hat = (embed / e_norm).astype(matmul_dtype)

    # N tile: a multiple of 128 when possible (lane-dense (M, TN) pairwise
    # tiles), else a multiple of 8, never exceeding N.  The N remainder is
    # masked in-kernel; x is NOT padded or copied in HBM.  D uses a
    # full-extent block, so no D padding either.
    if N >= 128:
        tn = min(max_tile_n, (N // 128) * 128)
    elif N >= 8:
        tn = min(max_tile_n, (N // 8) * 8)
    else:
        tn = N
    num_tiles = pl.cdiv(N, tn)

    itemsize = jnp.dtype(matmul_dtype).itemsize
    et_bytes = M * D * itemsize

    # et's block never changes across the grid; single-buffer it only when it
    # is big enough for the extra buffer to matter (v7x: 64 MiB VMEM).
    et_spec_kwargs = {}
    if et_bytes > (2 << 20):
        et_spec_kwargs["pipeline_mode"] = pl.Buffered(1)
    et_bufs = 1 if et_spec_kwargs else 2

    in_specs = [
        pl.BlockSpec((tn, D), lambda i: (i, 0)),              # x tile
        pl.BlockSpec((M, D), lambda i: (0, 0), **et_spec_kwargs),  # all prompts
    ]

    # Raise the scoped-VMEM cap above the 16 MiB v5e default only when the
    # working set needs it; stay <= 48 MiB so it also fits v7x's 64 MiB VMEM.
    est_vmem = (2 * tn * D * 4 + et_bufs * et_bytes
                + 8 * max(M, 8) * tn * 4 + (1 << 20))
    cp_kwargs = dict(dimension_semantics=("parallel",))
    if est_vmem > (12 << 20):
        cp_kwargs["vmem_limit_bytes"] = int(
            min(max(est_vmem + (8 << 20), 32 << 20), 48 << 20))

    kernel = functools.partial(_prompt_kernel, n_rows=N, tile_n=tn,
                               matmul_dtype=matmul_dtype)
    partials = pl.pallas_call(
        kernel,
        out_shape=jax.ShapeDtypeStruct((num_tiles, 8, 128), jnp.float32),
        grid=(num_tiles,),
        in_specs=in_specs,
        out_specs=pl.BlockSpec((1, 8, 128), lambda i: (i, 0, 0)),
        compiler_params=pltpu.CompilerParams(**cp_kwargs),
    )(x, e_hat)

    total = jnp.sum(partials[:, 0, 0])
    # weight.abs() * mean(sign(weight) * 2 * arcsin(.)^2)
    return jnp.abs(w) * jnp.sign(w) * (2.0 / (N * M)) * total


def prompt_reference(x, embed, weight):
    """Plain-JAX reference mirroring the PyTorch forward exactly."""
    xin = x.astype(jnp.float32)[:, None, :]                      # (N, 1, D)
    emb = embed.astype(jnp.float32)[None, :, :]                  # (1, M, D)
    xin_n = xin / jnp.maximum(
        jnp.linalg.norm(xin, axis=2, keepdims=True), 1e-12)
    emb_n = emb / jnp.maximum(
        jnp.linalg.norm(emb, axis=2, keepdims=True), 1e-12)
    dists = jnp.linalg.norm(xin_n - emb_n, axis=2) / 2.0
    dists = jnp.arcsin(dists) ** 2 * 2.0
    dists = dists * jnp.sign(weight)
    return jnp.abs(weight) * jnp.mean(dists)


# TODO(synk): ReplaceGrad / `stop` thresholding only alter the backward pass;
# a custom_vjp would be needed for gradient parity (forward value is identical).
# Known forward deviations vs torch (documented, pathological-input only):
# zero-norm vectors use the chord identity (cos=0) instead of F.normalize's
# zero vector, and |cos|>1 fp overshoot is clamped instead of producing NaN.

if __name__ == "__main__":
    key = jax.random.PRNGKey(0)
    k1, k2, k3, k4 = jax.random.split(key, 4)

    # Case 1: small shapes consistent with the module — 12 cutout embeddings,
    # 2 prompt embeddings, feature dim 32.  Exercises the N-remainder mask.
    x1 = jax.random.normal(k1, (12, 32), dtype=jnp.float32)
    e1 = jax.random.normal(k2, (2, 32), dtype=jnp.float32)
    w1 = 1.0

    # Case 2: multi-tile N with a ragged remainder and a negative weight.
    x2 = jax.random.normal(k3, (300, 96), dtype=jnp.float32)
    e2 = jax.random.normal(k4, (3, 96), dtype=jnp.float32)
    w2 = -0.7

    for (xi, ei, wi) in [(x1, e1, w1), (x2, e2, w2)]:
        ref = jax.block_until_ready(prompt_reference(xi, ei, jnp.float32(wi)))

        # f32-matmul path: tight agreement with the reference.
        out32 = jax.block_until_ready(
            prompt_forward(xi, ei, wi, matmul_dtype=jnp.float32))
        assert jnp.isfinite(out32), "f32 kernel produced non-finite output"
        assert abs(float(out32) - float(ref)) <= 1e-4 + 1e-4 * abs(float(ref)), (
            float(out32), float(ref))

        # bf16-matmul path (default, full MXU rate): looser tolerance.
        out16 = jax.block_until_ready(prompt_forward(xi, ei, wi))
        assert jnp.isfinite(out16), "bf16 kernel produced non-finite output"
        assert abs(float(out16) - float(ref)) <= 5e-4 + 1e-2 * abs(float(ref)), (
            float(out16), float(ref))

    print("KERNEL_OK")
</pallas_src>

<mosaic_0001>
module attributes {stable_mosaic.version = 11 : i64} {
  func.func @_prompt_kernel(%arg0: i32, %arg1: memref<8x32xf32, #tpu.memory_space<vmem>>, %arg2: memref<2x32xf32, #tpu.memory_space<vmem>>, %arg3: memref<1x8x128xf32, #tpu.memory_space<vmem>>) attributes {dimension_semantics = [#tpu.dimension_semantics<parallel>], iteration_bounds = array<i64: 2>, scalar_prefetch = 0 : i64, scratch_operands = 0 : i64, tpu.core_type = #tpu.core_type<tc>, window_params = [{transform_indices = @transform_0, window_bounds = array<i64: 8, 32>}, {pipeline_mode = #tpu.pipeline_mode<synchronous>, transform_indices = @transform_1, window_bounds = array<i64: 2, 32>}, {transform_indices = @transform_2, window_bounds = array<i64: 1, 8, 128>}]} {
    %c0 = arith.constant 0 : index
    %c0_0 = arith.constant 0 : index
    %0 = vector.load %arg1[%c0, %c0_0] : memref<8x32xf32, #tpu.memory_space<vmem>>, vector<8x32xf32>
    %1 = arith.mulf %0, %0 : vector<8x32xf32>
    %cst = arith.constant dense<0.000000e+00> : vector<8xf32>
    %2 = vector.multi_reduction <add>, %1, %cst [1] : vector<8x32xf32> to vector<8xf32>
    %3 = vector.shape_cast %2 : vector<8xf32> to vector<8x1xf32>
    %cst_1 = arith.constant 1.000000e-24 : f32
    %4 = vector.broadcast %cst_1 : f32 to vector<8x1xf32>
    %5 = arith.maximumf %3, %4 : vector<8x1xf32>
    %6 = math.rsqrt %5 : vector<8x1xf32>
    %7 = vector.broadcast %6 : vector<8x1xf32> to vector<8x32xf32>
    %8 = arith.mulf %0, %7 : vector<8x32xf32>
    %c0_2 = arith.constant 0 : index
    %c0_3 = arith.constant 0 : index
    %9 = vector.load %arg2[%c0_2, %c0_3] : memref<2x32xf32, #tpu.memory_space<vmem>>, vector<2x32xf32>
    %cst_4 = arith.constant dense<0.000000e+00> : vector<2x8xf32>
    %10 = tpu.matmul %9, %8, %cst_4 {dimension_numbers = #tpu.dot_dimension_numbers<[1], [1], [0], [0], [0, 0, 1, 0], [], []>} : vector<2x32xf32>, vector<8x32xf32>, vector<2x8xf32> -> vector<2x8xf32>
    %cst_5 = arith.constant 2.000000e+00 : f32
    %11 = vector.broadcast %cst_5 : f32 to vector<2x8xf32>
    %12 = arith.mulf %11, %10 : vector<2x8xf32>
    %cst_6 = arith.constant 2.000000e+00 : f32
    %13 = vector.broadcast %cst_6 : f32 to vector<2x8xf32>
    %14 = arith.subf %13, %12 : vector<2x8xf32>
    %cst_7 = arith.constant 0.000000e+00 : f32
    %15 = vector.broadcast %cst_7 : f32 to vector<2x8xf32>
    %16 = arith.maximumf %14, %15 : vector<2x8xf32>
    %17 = math.sqrt %16 : vector<2x8xf32>
    %cst_8 = arith.constant 5.000000e-01 : f32
    %18 = vector.broadcast %cst_8 : f32 to vector<2x8xf32>
    %19 = arith.mulf %18, %17 : vector<2x8xf32>
    %cst_9 = arith.constant 1.000000e+00 : f32
    %20 = vector.broadcast %cst_9 : f32 to vector<2x8xf32>
    %21 = arith.minimumf %19, %20 : vector<2x8xf32>
    %cst_10 = arith.constant 5.000000e-01 : f32
    %22 = vector.broadcast %cst_10 : f32 to vector<2x8xf32>
    %23 = arith.cmpf ogt, %21, %22 : vector<2x8xf32>
    %cst_11 = arith.constant 1.000000e+00 : f32
    %24 = vector.broadcast %cst_11 : f32 to vector<2x8xf32>
    %25 = arith.subf %24, %21 : vector<2x8xf32>
    %cst_12 = arith.constant 5.000000e-01 : f32
    %26 = vector.broadcast %cst_12 : f32 to vector<2x8xf32>
    %27 = arith.mulf %26, %25 : vector<2x8xf32>
    %28 = arith.mulf %21, %21 : vector<2x8xf32>
    %29 = arith.select %23, %27, %28 : vector<2x8xi1>, vector<2x8xf32>
    %30 = math.sqrt %29 : vector<2x8xf32>
    %31 = arith.select %23, %30, %21 : vector<2x8xi1>, vector<2x8xf32>
    %cst_13 = arith.constant 4.216320e-02 : f32
    %32 = vector.broadcast %cst_13 : f32 to vector<2x8xf32>
    %33 = arith.mulf %32, %29 : vector<2x8xf32>
    %cst_14 = arith.constant 0.024181312 : f32
    %34 = vector.broadcast %cst_14 : f32 to vector<2x8xf32>
    %35 = arith.addf %33, %34 : vector<2x8xf32>
    %36 = arith.mulf %35, %29 : vector<2x8xf32>
    %cst_15 = arith.constant 0.0454700254 : f32
    %37 = vector.broadcast %cst_15 : f32 to vector<2x8xf32>
    %38 = arith.addf %36, %37 : vector<2x8xf32>
    %39 = arith.mulf %38, %29 : vector<2x8xf32>
    %cst_16 = arith.constant 0.0749530047 : f32
    %40 = vector.broadcast %cst_16 : f32 to vector<2x8xf32>
    %41 = arith.addf %39, %40 : vector<2x8xf32>
    %42 = arith.mulf %41, %29 : vector<2x8xf32>
    %cst_17 = arith.constant 0.166667521 : f32
    %43 = vector.broadcast %cst_17 : f32 to vector<2x8xf32>
    %44 = arith.addf %42, %43 : vector<2x8xf32>
    %45 = arith.mulf %44, %29 : vector<2x8xf32>
    %46 = arith.mulf %45, %31 : vector<2x8xf32>
    %47 = arith.addf %46, %31 : vector<2x8xf32>
    %cst_18 = arith.constant 2.000000e+00 : f32
    %48 = vector.broadcast %cst_18 : f32 to vector<2x8xf32>
    %49 = arith.mulf %48, %47 : vector<2x8xf32>
    %cst_19 = arith.constant 1.57079637 : f32
    %50 = vector.broadcast %cst_19 : f32 to vector<2x8xf32>
    %51 = arith.subf %50, %49 : vector<2x8xf32>
    %52 = arith.select %23, %51, %47 : vector<2x8xi1>, vector<2x8xf32>
    %53 = arith.mulf %52, %52 : vector<2x8xf32>
    %c8_i32 = arith.constant 8 : i32
    %54 = arith.muli %arg0, %c8_i32 : i32
    %55 = tpu.iota {dimensions = array<i32: 1>} : vector<2x8xi32>
    %56 = vector.broadcast %54 : i32 to vector<2x8xi32>
    %57 = arith.addi %56, %55 : vector<2x8xi32>
    %c12_i32 = arith.constant 12 : i32
    %58 = vector.broadcast %c12_i32 : i32 to vector<2x8xi32>
    %59 = arith.cmpi slt, %57, %58 : vector<2x8xi32>
    %cst_20 = arith.constant 0.000000e+00 : f32
    %60 = vector.broadcast %cst_20 : f32 to vector<2x8xf32>
    %61 = arith.select %59, %53, %60 : vector<2x8xi1>, vector<2x8xf32>
    %62 = vector.shape_cast %61 : vector<2x8xf32> to vector<1x2x8xf32>
    %cst_21 = arith.constant dense<0.000000e+00> : vector<1xf32>
    %63 = vector.multi_reduction <add>, %62, %cst_21 [1, 2] : vector<1x2x8xf32> to vector<1xf32>
    %64 = vector.shape_cast %63 : vector<1xf32> to vector<1x1x1xf32>
    %65 = vector.extract %64[0, 0, 0] : f32 from vector<1x1x1xf32>
    %66 = vector.broadcast %65 : f32 to vector<1x8x128xf32>
    %c0_22 = arith.constant 0 : index
    %c0_23 = arith.constant 0 : index
    %c0_24 = arith.constant 0 : index
    %67 = vector.load %arg3[%c0_22, %c0_23, %c0_24] : memref<1x8x128xf32, #tpu.memory_space<vmem>>, vector<1x8x128xf32>
    tpu.vector_store %arg3[%c0_22, %c0_23, %c0_24], %66 {strides = array<i32>} : memref<1x8x128xf32, #tpu.memory_space<vmem>>, vector<1x8x128xf32>,
    return
  }
  func.func @transform_0(%arg0: i32) -> (i32, i32) {
    %c0_i32 = arith.constant 0 : i32
    %c0_i32_0 = arith.constant 0 : i32
    return %arg0, %c0_i32 : i32, i32
  }
  func.func @transform_1(%arg0: i32) -> (i32, i32) {
    %c0_i32 = arith.constant 0 : i32
    %c0_i32_0 = arith.constant 0 : i32
    %c0_i32_1 = arith.constant 0 : i32
    return %c0_i32, %c0_i32_0 : i32, i32
  }
  func.func @transform_2(%arg0: i32) -> (i32, i32, i32) {
    %c0_i32 = arith.constant 0 : i32
    %c0_i32_0 = arith.constant 0 : i32
    %c0_i32_1 = arith.constant 0 : i32
    return %arg0, %c0_i32, %c0_i32_0 : i32, i32, i32
  }
}

</mosaic_0001>

<bundles_post_ra>
// kernel: tpu_custom_call.1
= control target key start
LH: loop header
LB: loop body
LE: loop exit
PB: predicated region body
PF: predicated region fallthrough
CT: control target
= control target key end

     0   :  { %7 = vsyncpa [#allocation3], 0  ;;  %s756_s0 = inlined_call_operand.hbm [shape: f32[12,32], index: 0, kind: input, shape index: {}]   ;;  %s757_s1 = inlined_call_operand.vmem [shape: f32[2,32], index: 1, kind: input, shape index: {}]   ;;  %s758_s2 = inlined_call_operand.hbm [shape: f32[2,8,128], index: 2, kind: output, shape index: {}]  }
   0x1   :  { %9 = vsyncpa [#allocation3 + $0x1], 0 }
   0x2   :  { %10 = vsyncpa [#allocation4], 0 }
   0x3   :  { %12 = vsyncpa [#allocation4 + $0x1], 0  ;;  %s584_s9 = smov 0   ;;  %s586_s10 = smov 0  }
   0x4   :  { %s588_s11 = smov 0   ;;  %s590_s12 = smov 0  }
   0x5 LB: > { %s605_s13 = sadd.s32 4294967295, %s563_s12   ;;  %s389_s14 = sadd.s32 4294967294, %s563_s12   ;;  %s563_s12 = sphi %s590_s12, %s773_s12   ;;  %s559_s11 = sphi %s588_s11, %s772_s11   ;;  %s555_s10 = sphi %s586_s10, %s771_s10   ;;  %s551_s9 = sphi %s584_s9, %s770_s9  }
   0x6   : > { %s609_s15 = sadd.s32 1, %s563_s12   ;;  %s25_s16 = sadd.s32 1, %s559_s11 }
   0x7   : > { %s22_s17 = ssub.s32 %s563_s12, %s609_s15  ;;  %p32_p0 = scmp.ne.s32.totalorder %s559_s11, %s555_s10 }
   0x8   : > { %p23_p1 = scmp.eq.s32.totalorder %s22_s17, 0  ;;  %p33_p2 = scmp.eq.s32.totalorder %s563_s12, 0 }
   0x9   : > { %p38_p3 = scmp.ne.s32.totalorder %s555_s10, %s551_s9  ;;  %p39_p4 = scmp.eq.s32.totalorder %s605_s13, 0 }
   0xa   : > { %s621_s18 = scalar_select %p23_p1, %s559_s11, %s25_s16  }
   0xb   : > { %p623_p5 = por %p33_p2, %p32_p0  ;;  %p627_p6 = por %p39_p4, %p38_p3 }
   0xc   : > { %p83_p7 = scmp.eq.s32.totalorder %s605_s13, 1  ;;  %p89_p8 = scmp.eq.s32.totalorder %s389_s14, 1 }
   0xd   : > { %p425_p10 = scmp.lt.s32.totalorder %s563_s12, 2  ;;  %s112_s23 = sand.u32 1, %s559_s11  }
   0xe   : > { %p634_p11 = por %p83_p7, %p32_p0  ;;  %p638_p12 = por %p89_p8, %p38_p3 }
   0xf   : > { %s393_s24 = sshll.u32 %s563_s12, 7  ;;  %s392_s25 = sshll.u32 %s112_s23, 3 }
  0x10   : > { %s762_s21 = scalar_select %p634_p11, 1, 0 }
  0x11   : > { %s763_s22 = scalar_select %p638_p12, 1, 0 }
  0x12   : > { %s647_s28 = scalar_lea.hbm %s756_s0, %s393_s24  ;;  %s116_s29 = scalar_lea.vmem [#allocation2], %s392_s25 }
  0x13   : > { %s123_s30 = sshll.u32 %s116_s29, 4  ;;  %p651_p13 = pnand %p425_p10, %p623_p5  ;;  %s655_s30 = int_to_ptr.vmem [resolvable:$true] %s123_s30 }
  0x14   : > { %s113_s4 = scalar_lea.sflag [#allocation3], %s112_s23  ;;  %s467_s5 = scalar_lea.hbm %s647_s28, 128 }
  0x15   : > { %p468_p2 = scmp.ne.s32.totalorder %s647_s28, %s467_s5  ;;  %p469_p3 = pneg %p651_p13 }
  0x16   : > { %s472_s8 = scalar_lea.hbm %s756_s0, 256  ;;  %p473_p5 = scmp.lt.u32.totalorder %s647_s28, %s756_s0 }
  0x17   : > { %p470_p4 = pnand %p469_p3, %p468_p2  ;;  %p474_p8 = scmp.lt.u32.totalorder %s472_s8, %s467_s5 }
  0x18   : > { %p476_p9 = scmp.lt.u32.totalorder %s467_s5, %s647_s28 }
  0x19   : > { %p471_p7 = pneg %p470_p4  ;;  %p475_p10 = por %p474_p8, %p473_p5 }
  0x1b   : > { %p477_p0 = por %p476_p9, %p475_p10 }
  0x1d   : > { %p478_p1 = pnand %p477_p0, %p471_p7 }
  0x1f   : > { %481 = shalt.err (!%p478_p1)
}
  0x20   : > { %s482_s17 = scalar_lea.vmem %s655_s30, 128  ;;  %s565_s19 = smov [#allocation2]  }
  0x21   : > { %p483_p2 = scmp.ne.s32.totalorder %s655_s30, %s482_s17  ;;  %s487_s23 = sshll.u32 %s565_s19, 4  ;;  %s488_s23 = int_to_ptr.vmem [resolvable:$false] %s487_s23 }
  0x22   : > { %s489_s24 = scalar_lea.vmem %s488_s23, 256  ;;  %p490_p11 = scmp.lt.s32.totalorder %s655_s30, %s488_s23 }
  0x23   : > { %p485_p4 = pnand %p483_p2, %p469_p3  ;;  %p491_p5 = scmp.lt.s32.totalorder %s489_s24, %s482_s17 }
  0x25   : > { %p486_p12 = pneg %p485_p4  ;;  %p492_p8 = por %p491_p5, %p490_p11 }
  0x27   : > { %p493_p9 = pnand %p492_p8, %p486_p12 }
  0x29   : > { %496 = shalt.err (!%p493_p9)
}
  0x2a   : > { %420 = dma.hbm_to_vmem [thread:$0]  (!%p651_p13), %s647_s28, 128, %s655_s30, %s113_s4  }
  0x2b   : > { %p765_p0 = scmp.lt.s32.totalorder %s563_s12, 3  ;;  %p766_p1 = scmp.ge.s32.totalorder %s563_s12, 1 }
  0x2d   : > { %p129_p3 = pnand %p766_p1, %p765_p0 }
  0x2e   : > { %s689_s25 = sand.u32 (!%p129_p3), 1, %s555_s10  }
  0x2f   : > { %132 = sbr.rel (%p129_p3) target bundleno = 711 (0x2c7), region = 28  ;;  %s395_s26 = sshll.u32 (!%p129_p3), %s689_s25, 3 }
  0x30   : > { %s135_s27 = scalar_lea.sflag (!%p129_p3), [#allocation3], %s689_s25  ;;  %s138_s29 = scalar_lea.vmem (!%p129_p3), [#allocation2], %s395_s26 }
  0x36   : > { %542 = dma.done.wait (%p627_p6), %s135_s27, 128  }
  0x37   : > { %544 = vsyncadd (%p627_p6), %s135_s27, 4294967168  ;;  %v159_v0 = vld [vmem:[%s138_s29] sm:$0xff]  ;;  %vm161_vm0 = vcmask 261120   ;;  %v566_v3 = vmov 0.0   ;;  %vm567_vm1 = vmmov 0   ;;  %v286_v38 = vlaneseq  ;;  %s399_s20 = sshll.u32 %s605_s13, 3 }
  0x38   : > { %v160_v1 = vmul.f32 %v159_v0, %v159_v0  ;;  %406 = vmatprep.subr.mxu0 %v566_v3  ;;  %408 = vmatprep.mubr.msk.f32.mxu0 %vm567_vm1, %v566_v3  ;;  %v168_v8 = vld [vmem:[%s757_s1] sm:$0x3]  ;;  %v288_v43 = vstv %s399_s20  ;;  %vm292_vm8 = vcmask 58368   ;;  %s158_s3 = scalar_lea.vmem [#allocation5], %s395_s26  ;;  %s401_s5 = sshll.u32 %s605_s13, 7 }
  0x39   : > { %v287_v42 = vand.u32 127, %v286_v38  ;;  %s319_s4 = sshll.u32 %s158_s3, 4  ;;  %s714_s14 = scalar_lea.hbm %s758_s2, %s401_s5  ;;  %s709_s4 = int_to_ptr.vmem [resolvable:$true] %s319_s4 }
  0x3a   : > { %v162_v2 = vsel %vm161_vm0, %v160_v1, 0.0  ;;  %s306_s16 = scalar_lea.sflag [#allocation4], %s689_s25  ;;  %s497_s17 = scalar_lea.vmem %s709_s4, 128 }
  0x3b   : > { %163 = vadd.xlane.f32.xlu0 %v162_v2  ;;  %v289_v46 = vadd.s32 %v288_v43, %v287_v42  ;;  %p498_p6 = scmp.ne.s32.totalorder %s709_s4, %s497_s17  ;;  %p767_p11 = scmp.ne.s32.totalorder %s762_s21, 0 }
  0x3c   : > { %s568_s13 = smov [#allocation5]  }
  0x3d   : > { %vm290_vm7 = vcmp.lt.s32.totalorder %v289_v46, 12  ;;  %p499_p12 = pnand %p498_p6, %p767_p11  ;;  %s501_s19 = sshll.u32 %s568_s13, 4  ;;  %s502_s19 = int_to_ptr.vmem [resolvable:$false] %s501_s19 }
  0x3e   : > { %s503_s23 = scalar_lea.vmem %s502_s19, 256  ;;  %p504_p7 = scmp.lt.s32.totalorder %s709_s4, %s502_s19 }
  0x3f   : > { %p500_p13 = pneg %p499_p12  ;;  %p505_p10 = scmp.lt.s32.totalorder %s503_s23, %s497_s17 }
  0x41   : > { %p506_p2 = por %p505_p10, %p504_p7 }
  0x43   : > { %p507_p4 = pnand %p506_p2, %p500_p13 }
  0xc8   : > { %v164_v4 = vpop.xlane.xlu0 %163 }
  0xc9   : > { %v165_v5 = vmax.f32 %v164_v4, 1e-24 }
  0xcb   : > { %461 = vrsqrt.f32 %v165_v5 }
  0xd5   : > { %v462_v6 = vpop.eup %461 }
  0xd6   : > { %v167_v7 = vmul.f32 %v462_v6, %v159_v0 }
  0xd8   : > { %407 = vmatpush3.xpose.msk.msra.mxu0 %vm161_vm0, %v167_v7 }
  0xdb   : > { %409 = vmatmul.mubr.msk.f32.vlgmr.msra.gmra.mrb[0].mxu0 %vm161_vm0, %v168_v8 }
 0x1ae   : > { %v241_v9 = vpop.f32.mrb[0].mxu0 }
 0x1af   : > { %v245_v10 = vmul.f32 2.0, %v241_v9  ;;  %v410_v11 = vpop.f32.mrb[1].mxu0 }
 0x1b1   : > { %v246_v12 = vsub.f32 2.0, %v245_v10 }
 0x1b3   : > { %v247_v13 = vmax.f32 %v246_v12, 0.0 }
 0x1b5   : > { %463 = vrsqrt.f32 %v247_v13  ;;  %vm250_vm2 = vcmp.eq.f32.partialorder %v247_v13, inf  ;;  %v253_v16 = vand.u32 2147483648, %v247_v13  ;;  %vm252_vm3 = vcmp.eq.f32.partialorder %v247_v13, 0.0 }
 0x1bf   : > { %v464_v14 = vpop.eup %463 }
 0x1c0   : > { %v249_v15 = vmul.f32 %v464_v14, %v247_v13 }
 0x1c2   : > { %v251_v17 = vsel %vm250_vm2, %v247_v13, %v249_v15 }
 0x1c3   : > { %v254_v18 = vsel %vm252_vm3, %v253_v16, %v251_v17 }
 0x1c4   : > { %v255_v19 = vmul.f32 0.5, %v254_v18 }
 0x1c6   : > { %v256_v20 = vmin.f32 %v255_v19, 1.0 }
 0x1c8   : > { %v258_v21 = vsub.f32 1.0, %v256_v20  ;;  %v260_v23 = vmul.f32 %v256_v20, %v256_v20  ;;  %vm257_vm4 = vcmp.gt.f32.partialorder %v256_v20, 0.5 }
 0x1ca   : > { %v259_v22 = vmul.f32 0.5, %v258_v21 }
 0x1cc   : > { %v261_v24 = vsel %vm257_vm4, %v259_v22, %v260_v23 }
 0x1cd   : > { %465 = vrsqrt.f32 %v261_v24  ;;  %v270_v25 = vmul.f32 0.0421632, %v261_v24  ;;  %vm264_vm5 = vcmp.eq.f32.partialorder %v261_v24, inf  ;;  %v267_v34 = vand.u32 2147483648, %v261_v24 }
 0x1ce   : > { %vm266_vm6 = vcmp.eq.f32.partialorder %v261_v24, 0.0 }
 0x1cf   : > { %v271_v26 = vadd.f32 0.024181312, %v270_v25 }
 0x1d1   : > { %v272_v27 = vmul.f32 %v271_v26, %v261_v24 }
 0x1d3   : > { %v273_v28 = vadd.f32 0.045470025, %v272_v27 }
 0x1d5   : > { %v274_v29 = vmul.f32 %v273_v28, %v261_v24 }
 0x1d7   : > { %v466_v30 = vpop.eup %465  ;;  %v275_v32 = vadd.f32 0.074953005, %v274_v29 }
 0x1d8   : > { %v263_v31 = vmul.f32 %v466_v30, %v261_v24 }
 0x1d9   : > { %v276_v35 = vmul.f32 %v275_v32, %v261_v24 }
 0x1da   : > { %v265_v33 = vsel %vm264_vm5, %v261_v24, %v263_v31 }
 0x1db   : > { %v268_v36 = vsel %vm266_vm6, %v267_v34, %v265_v33  ;;  %v277_v37 = vadd.f32 0.16666752, %v276_v35 }
 0x1dc   : > { %v269_v40 = vsel %vm257_vm4, %v268_v36, %v256_v20 }
 0x1dd   : > { %v278_v39 = vmul.f32 %v277_v37, %v261_v24 }
 0x1df   : > { %v279_v41 = vmul.f32 %v278_v39, %v269_v40 }
 0x1e1   : > { %v280_v44 = vadd.f32 %v279_v41, %v269_v40 }
 0x1e3   : > { %v281_v45 = vmul.f32 2.0, %v280_v44 }
 0x1e5   : > { %v282_v47 = vsub.f32 1.5707964, %v281_v45 }
 0x1e7   : > { %v283_v48 = vsel %vm257_vm4, %v282_v47, %v280_v44 }
 0x1e8   : > { %v284_v49 = vmul.f32 %v283_v48, %v283_v48 }
 0x1ea   : > { %v291_v50 = vsel %vm290_vm7, %v284_v49, 0.0 }
 0x1eb   : > { %v293_v51 = vsel %vm292_vm8, %v291_v50, 0.0 }
 0x1ec   : > { %294 = vadd.xlane.f32.xlu0 %v293_v51 }
 0x279   : > { %v295_v52 = vpop.xlane.xlu0 %294 }
 0x27a   : > { %v296_v53 = vrot.slane %v295_v52, 4 }
 0x27c   : > { %v297_v54 = vadd.f32 %v296_v53, %v295_v52 }
 0x27e   : > { %v298_v55 = vrot.slane %v297_v54, 2 }
 0x280   : > { %v299_v56 = vadd.f32 %v298_v55, %v297_v54 }
 0x282   : > { %v300_v57 = vrot.slane %v299_v56, 1 }
 0x284   : > { %v301_v58 = vadd.f32 %v300_v57, %v299_v56 }
 0x286   : > { %411 = vpush %v301_v58 }
 0x2b7   : > { %s412_s6 = spop %411 }
 0x2b8   : > { %v303_v59 = vstv %s412_s6 }
 0x2b9   : > { %304 = vst [vmem:[%s158_s3] sm:$0xff] %v303_v59 }
 0x2ba   : > { %510 = shalt.err (!%p507_p4)
}
 0x2bb   : > { %s511_s24 = scalar_lea.hbm %s714_s14, 128  ;;  %s515_s27 = scalar_lea.hbm %s758_s2, 256 }
 0x2bc   : > { %p512_p5 = scmp.ne.s32.totalorder %s714_s14, %s511_s24  ;;  %p516_p0 = scmp.lt.u32.totalorder %s714_s14, %s758_s2 }
 0x2bd   : > { %p517_p1 = scmp.lt.u32.totalorder %s515_s27, %s511_s24  ;;  %p519_p6 = scmp.lt.u32.totalorder %s511_s24, %s714_s14 }
 0x2be   : > { %p513_p8 = pnand %p512_p5, %p767_p11 }
 0x2bf   : > { %p518_p3 = por %p517_p1, %p516_p0 }
 0x2c0   : > { %p514_p9 = pneg %p513_p8 }
 0x2c1   : > { %p520_p12 = por %p519_p6, %p518_p3 }
 0x2c3   : > { %p521_p13 = pnand %p520_p12, %p514_p9 }
 0x2c5   : > { %524 = shalt.err (!%p521_p13)
}
 0x2c6   : > { %415 = dma.vmem_to_hbm [thread:$0]  (%p767_p11), %s709_s4, 128, %s714_s14, %s306_s16  }
 0x2c7 PF: > { %s331_s30 = sand.u32 1, %s551_s9   ;;  %p768_p7 = scmp.ne.s32.totalorder %s763_s22, 0 }
 0x2c8   : > { %p769_p10 = scmp.ge.s32.totalorder %s563_s12, 2  ;;  %s332_s20 = scalar_lea.sflag [#allocation4], %s331_s30 }
 0x2ca   : > { %p422_p2 = pnand %p769_p10, %p768_p7 }
 0x2cc   : > { %546 = dma.done.wait (!%p422_p2), %s332_s20, 128  }
 0x2cd   : > { %548 = vsyncadd (!%p422_p2), %s332_s20, 4294967168  ;;  %p15_p4 = scmp.ge.s32.totalorder %s609_s15, 4   ;;  %s770_s9 = smov %s555_s10 }
 0x2ce   : > { %s771_s10 = smov %s559_s11  ;;  %s772_s11 = smov %s621_s18 }
 0x2cf   : > { %s773_s12 = smov %s609_s15  ;;  %17 = sbr.rel (!%p15_p4) target bundleno = 5 (0x5), region = 73 }
 0x2d6   :  { %337 = vsyncpa [#allocation3], 1 }
 0x2d7   :  { %339 = vsyncpa [#allocation3 + $0x1], 1 }
 0x2d8   :  { %340 = vsyncpa [#allocation4], 1 }
 0x2d9   :  { %342 = vsyncpa [#allocation4 + $0x1], 1 }

</bundles_post_ra>
